<compile_context>
chip_gen: v7x
topology: tpu7x:2x2x1
jax: 0.10.0
libtpu: 0.0.40
codegen_flags: <defaults>
</compile_context>

<pallas_src>
import jax
import jax.numpy as jnp
from jax import lax
from jax.experimental import pallas as pl
from jax.experimental.pallas import tpu as pltpu

_EPS = 1e-5
_LANE = 128


def _ln_withbias_kernel(x_ref, w_ref, b_ref, o_ref):
    # x_ref: (C, T) block; w_ref / b_ref: (C, 1); o_ref: (C, T)
    x = x_ref[...].astype(jnp.float32)
    inv_c = jnp.float32(1.0 / x.shape[0])
    mu = jnp.sum(x, axis=0, keepdims=True) * inv_c           # E[x]   (1, T)
    ex2 = jnp.sum(x * x, axis=0, keepdims=True) * inv_c      # E[x^2] (1, T)
    var = ex2 - mu * mu
    inv = lax.rsqrt(var + _EPS)                               # EUP rsqrt
    y = (x - mu) * inv * w_ref[...].astype(jnp.float32) + b_ref[...].astype(jnp.float32)
    o_ref[...] = y.astype(o_ref.dtype)


def _ln_biasfree_kernel(x_ref, w_ref, o_ref):
    x = x_ref[...].astype(jnp.float32)
    inv_c = jnp.float32(1.0 / x.shape[0])
    mu = jnp.sum(x, axis=0, keepdims=True) * inv_c
    ex2 = jnp.sum(x * x, axis=0, keepdims=True) * inv_c
    var = ex2 - mu * mu
    inv = lax.rsqrt(var + _EPS)
    # BiasFree variant scales the *raw* x (no mean subtraction in the
    # numerator), matching Restormer's BiasFree_LayerNorm exactly.
    y = x * inv * w_ref[...].astype(jnp.float32)
    o_ref[...] = y.astype(o_ref.dtype)


def _round_up(x, m):
    return ((x + m - 1) // m) * m


def _vmem_capacity_bytes():
    try:
        return int(pltpu.get_tpu_info().vmem_capacity_bytes)
    except Exception:
        return 64 * 1024 * 1024  # conservative fallback (v7x per-TC capacity)


def _pick_hw_tile(hw, c, itemsize, batch, vmem_cap):
    """Largest lane-dense (128-multiple) HW tile within a generation-aware
    VMEM budget.  HW need not divide the tile: the final grid step is masked."""
    # Live bytes per lane column per grid step:
    #   2x double-buffered input + 2x output at input itemsize
    #   + ~3 fp32 temporaries (x in fp32, x*x / centered, y).
    bytes_per_col = c * (4 * itemsize + 3 * 4)
    # ~40% of physical VMEM for live blocks: ~25 MiB on v7x, ~51 MiB on v5e/v6e.
    budget = max(int(vmem_cap * 0.4), 4 * 1024 * 1024)
    t = (budget // bytes_per_col) // _LANE * _LANE
    t = max(t, _LANE)
    t = min(t, _round_up(hw, _LANE))  # never exceed the (rounded) full extent
    # Megacore balance (v7x has 2 TCs/chip): when the batch is odd, make the
    # total grid-step count even so work shards evenly across both cores.
    if vmem_cap <= 64 * 1024 * 1024 and batch % 2 == 1 and hw > _LANE:
        t = min(t, _round_up(pl.cdiv(hw, 2), _LANE))
        while pl.cdiv(hw, t) % 2 == 1 and t > _LANE:
            t -= _LANE
    return t


def layer_norm(x, weight, bias=None, *, layernorm_type="WithBias"):
    """Forward of the PyTorch LayerNorm module (Restormer)."""
    if x.ndim == 3:
        # Module's (B, N, C) branch: normalize over the last dim.  Reuse the
        # channel-normalizing kernel by viewing the data as (B, C, 1, N).
        # TODO(synk): the 3-D branch pays a transpose in the wrapper; the 4-D
        # NCHW path is fully transpose-free.
        B, N, C = x.shape
        x4 = jnp.swapaxes(x, 1, 2).reshape(B, C, 1, N)
        y4 = layer_norm(x4, weight, bias, layernorm_type=layernorm_type)
        return jnp.swapaxes(y4.reshape(B, C, N), 1, 2)

    assert x.ndim == 4, "expected (B, C, H, W) or (B, N, C)"
    B, C, H, W = x.shape
    assert weight.shape == (C,)
    hw = H * W
    x3 = x.reshape(B, C, hw)          # free metadata reshape (no data movement)
    w2 = weight.reshape(C, 1)

    itemsize = jnp.dtype(x.dtype).itemsize
    vmem_cap = _vmem_capacity_bytes()
    t = _pick_hw_tile(hw, C, itemsize, B, vmem_cap)
    n_hw = pl.cdiv(hw, t)

    # Scoped-VMEM limit sized from the real working set (incl. fp32 temps).
    io_bytes = 4 * C * t * itemsize       # 2x double-buffered in + 2x out
    temp_bytes = 3 * C * t * 4            # fp32 temporaries inside the kernel
    need = io_bytes + temp_bytes + (2 << 20)
    vmem_limit = int(min(max(need, 16 << 20), vmem_cap * 3 // 4))

    x_spec = pl.BlockSpec((pl.Squeezed(), C, t), lambda b, j: (b, 0, j))
    p_spec = pl.BlockSpec((C, 1), lambda b, j: (0, 0))
    o_spec = pl.BlockSpec((pl.Squeezed(), C, t), lambda b, j: (b, 0, j))

    if layernorm_type == "BiasFree":
        kernel = _ln_biasfree_kernel
        in_specs = [x_spec, p_spec]
        args = (x3, w2)
    else:
        assert bias is not None and bias.shape == (C,)
        kernel = _ln_withbias_kernel
        in_specs = [x_spec, p_spec, p_spec]
        args = (x3, w2, bias.reshape(C, 1))

    out = pl.pallas_call(
        kernel,
        out_shape=jax.ShapeDtypeStruct((B, C, hw), x.dtype),
        grid_spec=pltpu.PrefetchScalarGridSpec(
            num_scalar_prefetch=0,
            grid=(B, n_hw),
            in_specs=in_specs,
            out_specs=o_spec,
        ),
        compiler_params=pltpu.CompilerParams(
            dimension_semantics=("parallel", "parallel"),
            vmem_limit_bytes=vmem_limit,
        ),
    )(*args)

    return out.reshape(B, C, H, W)


def _ref_ln(x, weight, bias, layernorm_type):
    b, c, h, w = x.shape
    x3 = jnp.swapaxes(x.reshape(b, c, h * w), 1, 2)  # (B, HW, C)
    mu = x3.mean(-1, keepdims=True)
    var = jnp.mean((x3 - mu) ** 2, axis=-1, keepdims=True)
    if layernorm_type == "BiasFree":
        y = x3 / jnp.sqrt(var + _EPS) * weight
    else:
        y = (x3 - mu) / jnp.sqrt(var + _EPS) * weight + bias
    return jnp.swapaxes(y, 1, 2).reshape(b, c, h, w)


if __name__ == "__main__":
    key = jax.random.PRNGKey(0)
    kx, kw, kb, kx2 = jax.random.split(key, 4)

    B, C, H, W = 2, 4, 16, 16
    x = jax.random.normal(kx, (B, C, H, W), dtype=jnp.float32)
    weight = 1.0 + 0.1 * jax.random.normal(kw, (C,), dtype=jnp.float32)
    bias = 0.1 * jax.random.normal(kb, (C,), dtype=jnp.float32)

    # WithBias variant (the default when LayerNorm_type != 'BiasFree').
    y_wb = jax.block_until_ready(layer_norm(x, weight, bias, layernorm_type="WithBias"))
    assert y_wb.shape == (B, C, H, W) and y_wb.dtype == x.dtype
    assert jnp.allclose(y_wb, _ref_ln(x, weight, bias, "WithBias"), rtol=1e-4, atol=1e-4)

    # BiasFree variant.
    y_bf = jax.block_until_ready(layer_norm(x, weight, layernorm_type="BiasFree"))
    assert jnp.allclose(y_bf, _ref_ln(x, weight, bias, "BiasFree"), rtol=1e-4, atol=1e-4)

    # Masked final-tile path: HW (144) not a multiple of 128, odd batch.
    B2, C2, H2, W2 = 1, 8, 12, 12
    x2 = jax.random.normal(kx2, (B2, C2, H2, W2), dtype=jnp.float32)
    w2_ = 1.0 + 0.05 * jax.random.normal(kw, (C2,), dtype=jnp.float32)
    b2_ = 0.05 * jax.random.normal(kb, (C2,), dtype=jnp.float32)
    y2 = jax.block_until_ready(layer_norm(x2, w2_, b2_, layernorm_type="WithBias"))
    assert jnp.allclose(y2, _ref_ln(x2, w2_, b2_, "WithBias"), rtol=1e-4, atol=1e-4)

    print("KERNEL_OK")
</pallas_src>

<mosaic_0001>
module attributes {stable_mosaic.version = 11 : i64} {
  func.func @_ln_withbias_kernel(%arg0: i32, %arg1: i32, %arg2: memref<1x4x256xf32, #tpu.memory_space<vmem>>, %arg3: memref<4x1xf32, #tpu.memory_space<vmem>>, %arg4: memref<4x1xf32, #tpu.memory_space<vmem>>, %arg5: memref<1x4x256xf32, #tpu.memory_space<vmem>>) attributes {dimension_semantics = [#tpu.dimension_semantics<parallel>, #tpu.dimension_semantics<parallel>], iteration_bounds = array<i64: 2, 1>, scalar_prefetch = 0 : i64, scratch_operands = 0 : i64, tpu.core_type = #tpu.core_type<tc>, window_params = [{transform_indices = @transform_0, window_bounds = array<i64: 1, 4, 256>}, {pipeline_mode = #tpu.pipeline_mode<synchronous>, transform_indices = @transform_1, window_bounds = array<i64: 4, 1>}, {pipeline_mode = #tpu.pipeline_mode<synchronous>, transform_indices = @transform_2, window_bounds = array<i64: 4, 1>}, {transform_indices = @transform_3, window_bounds = array<i64: 1, 4, 256>}]} {
    %c0 = arith.constant 0 : index
    %c0_0 = arith.constant 0 : index
    %c0_1 = arith.constant 0 : index
    %0 = vector.load %arg2[%c0, %c0_0, %c0_1] : memref<1x4x256xf32, #tpu.memory_space<vmem>>, vector<1x4x256xf32>
    %1 = vector.shape_cast %0 : vector<1x4x256xf32> to vector<4x256xf32>
    %cst = arith.constant dense<0.000000e+00> : vector<256xf32>
    %2 = vector.multi_reduction <add>, %1, %cst [0] : vector<4x256xf32> to vector<256xf32>
    %3 = vector.shape_cast %2 : vector<256xf32> to vector<1x256xf32>
    %cst_2 = arith.constant 2.500000e-01 : f32
    %4 = vector.broadcast %cst_2 : f32 to vector<1x256xf32>
    %5 = arith.mulf %3, %4 : vector<1x256xf32>
    %6 = arith.mulf %1, %1 : vector<4x256xf32>
    %cst_3 = arith.constant dense<0.000000e+00> : vector<256xf32>
    %7 = vector.multi_reduction <add>, %6, %cst_3 [0] : vector<4x256xf32> to vector<256xf32>
    %8 = vector.shape_cast %7 : vector<256xf32> to vector<1x256xf32>
    %cst_4 = arith.constant 2.500000e-01 : f32
    %9 = vector.broadcast %cst_4 : f32 to vector<1x256xf32>
    %10 = arith.mulf %8, %9 : vector<1x256xf32>
    %11 = arith.mulf %5, %5 : vector<1x256xf32>
    %12 = arith.subf %10, %11 : vector<1x256xf32>
    %cst_5 = arith.constant 9.99999974E-6 : f32
    %13 = vector.broadcast %cst_5 : f32 to vector<1x256xf32>
    %14 = arith.addf %12, %13 : vector<1x256xf32>
    %15 = math.rsqrt %14 : vector<1x256xf32>
    %16 = vector.broadcast %5 : vector<1x256xf32> to vector<4x256xf32>
    %17 = arith.subf %1, %16 : vector<4x256xf32>
    %18 = vector.broadcast %15 : vector<1x256xf32> to vector<4x256xf32>
    %19 = arith.mulf %17, %18 : vector<4x256xf32>
    %c0_6 = arith.constant 0 : index
    %c0_7 = arith.constant 0 : index
    %20 = vector.load %arg3[%c0_6, %c0_7] : memref<4x1xf32, #tpu.memory_space<vmem>>, vector<4x1xf32>
    %21 = vector.broadcast %20 : vector<4x1xf32> to vector<4x256xf32>
    %22 = arith.mulf %19, %21 : vector<4x256xf32>
    %c0_8 = arith.constant 0 : index
    %c0_9 = arith.constant 0 : index
    %23 = vector.load %arg4[%c0_8, %c0_9] : memref<4x1xf32, #tpu.memory_space<vmem>>, vector<4x1xf32>
    %24 = vector.broadcast %23 : vector<4x1xf32> to vector<4x256xf32>
    %25 = arith.addf %22, %24 : vector<4x256xf32>
    %c0_10 = arith.constant 0 : index
    %c0_11 = arith.constant 0 : index
    %c0_12 = arith.constant 0 : index
    %26 = vector.load %arg5[%c0_10, %c0_11, %c0_12] : memref<1x4x256xf32, #tpu.memory_space<vmem>>, vector<1x4x256xf32>
    %27 = vector.shape_cast %26 : vector<1x4x256xf32> to vector<4x256xf32>
    %28 = vector.shape_cast %25 : vector<4x256xf32> to vector<1x4x256xf32>
    tpu.vector_store %arg5[%c0_10, %c0_11, %c0_12], %28 {strides = array<i32>} : memref<1x4x256xf32, #tpu.memory_space<vmem>>, vector<1x4x256xf32>,
    return
  }
  func.func @transform_0(%arg0: i32, %arg1: i32) -> (i32, i32, i32) {
    %c0_i32 = arith.constant 0 : i32
    %c0_i32_0 = arith.constant 0 : i32
    return %arg0, %c0_i32, %arg1 : i32, i32, i32
  }
  func.func @transform_1(%arg0: i32, %arg1: i32) -> (i32, i32) {
    %c0_i32 = arith.constant 0 : i32
    %c0_i32_0 = arith.constant 0 : i32
    %c0_i32_1 = arith.constant 0 : i32
    return %c0_i32, %c0_i32_0 : i32, i32
  }
  func.func @transform_2(%arg0: i32, %arg1: i32) -> (i32, i32) {
    %c0_i32 = arith.constant 0 : i32
    %c0_i32_0 = arith.constant 0 : i32
    %c0_i32_1 = arith.constant 0 : i32
    return %c0_i32, %c0_i32_0 : i32, i32
  }
  func.func @transform_3(%arg0: i32, %arg1: i32) -> (i32, i32, i32) {
    %c0_i32 = arith.constant 0 : i32
    %c0_i32_0 = arith.constant 0 : i32
    return %arg0, %c0_i32, %arg1 : i32, i32, i32
  }
}

</mosaic_0001>

<bundles_post_ra>
// kernel: tpu_custom_call.1
= control target key start
LH: loop header
LB: loop body
LE: loop exit
PB: predicated region body
PF: predicated region fallthrough
CT: control target
= control target key end

     0   :  { %8 = vsyncpa [#allocation3], 0  ;;  %s803_s0 = inlined_call_operand.hbm [shape: f32[2,4,256], index: 0, kind: input, shape index: {}]   ;;  %s804_s1 = inlined_call_operand.vmem [shape: f32[4,1], index: 1, kind: input, shape index: {}]   ;;  %s805_s2 = inlined_call_operand.vmem [shape: f32[4,1], index: 2, kind: input, shape index: {}]   ;;  %s806_s3 = inlined_call_operand.hbm [shape: f32[2,4,256], index: 3, kind: output, shape index: {}]  }
   0x1   :  { %10 = vsyncpa [#allocation3 + $0x1], 0 }
   0x2   :  { %11 = vsyncpa [#allocation4], 0 }
   0x3   :  { %13 = vsyncpa [#allocation4 + $0x1], 0  ;;  %s621_s12 = smov 0   ;;  %s623_s13 = smov 0  }
   0x4   :  { %s625_s14 = smov 0   ;;  %s627_s15 = smov 0  }
   0x5   :  { %s629_s16 = smov 0   ;;  %s631_s17 = smov 0  }
   0x6 LB: > { %s396_s18 = sadd.s32 4294967295, %s595_s17   ;;  %s397_s19 = sadd.s32 4294967294, %s595_s17   ;;  %s595_s17 = sphi %s631_s17, %s19_s17   ;;  %s591_s16 = sphi %s629_s16, %s822_s16   ;;  %s587_s15 = sphi %s627_s15, %s821_s15   ;;  %s583_s14 = sphi %s625_s14, %s820_s14   ;;  %s579_s13 = sphi %s623_s13, %s819_s13   ;;  %s575_s12 = sphi %s621_s12, %s818_s12  }
   0x7   : > { %s31_s20 = sadd.s32 1, %s591_s16  ;;  %s40_s21 = sadd.s32 1, %s583_s14 }
   0x8   : > { %p33_p0 = scmp.ge.s32.totalorder %s31_s20, 2  ;;  %p47_p1 = scmp.ne.s32.totalorder %s583_s14, %s579_s13 }
   0x9   : > { %p48_p2 = scmp.eq.s32.totalorder %s595_s17, 0  ;;  %p53_p3 = scmp.ne.s32.totalorder %s579_s13, %s575_s12 }
   0xa   : > { %s824_s20 = smov (%p33_p0, %s31_s20), 0  ;;  %p54_p5 = scmp.eq.s32.totalorder %s396_s18, 0 }
   0xb   : > { %p662_p4 = por %p48_p2, %p47_p1  ;;  %s35_s23 = ssub.s32 %s591_s16, %s824_s20 }
   0xc   : > { %p121_p6 = scmp.eq.s32.totalorder %s396_s18, 1  ;;  %p38_p7 = scmp.eq.s32.totalorder %s35_s23, 0 }
   0xd   : > { %p668_p8 = por %p54_p5, %p53_p3  ;;  %p127_p10 = scmp.eq.s32.totalorder %s397_s19, 1 }
   0xe   : > { %p672_p9 = por %p121_p6, %p47_p1  ;;  %p425_p13 = scmp.lt.s32.totalorder %s595_s17, 2 }
   0xf   : > { %s677_s26 = scalar_select %p38_p7, %s583_s14, %s40_s21  }
  0x10   : > { %s810_s25 = scalar_select %p672_p9, 1, 0 }
  0x11   : > { %p679_p11 = por %p127_p10, %p53_p3  ;;  %s153_s28 = sand.u32 1, %s583_s14  }
  0x12   : > { %s400_s29 = sshll.u32 %s153_s28, 3  ;;  %s411_s30 = sshll.u32 %s591_s16, 7 }
  0x13   : > { %s811_s27 = scalar_select %p679_p11, 1, 0 }
  0x14   : > { %s690_s6 = scalar_lea.hbm %s803_s0, %s411_s30  ;;  %s157_s7 = scalar_lea.vmem [#allocation2], %s400_s29 }
  0x15   : > { %s167_s8 = sshll.u32 %s157_s7, 4  ;;  %p696_p0 = pnand %p425_p13, %p662_p4  ;;  %s692_s8 = int_to_ptr.vmem [resolvable:$true] %s167_s8 }
  0x16   : > { %s154_s10 = scalar_lea.sflag [#allocation3], %s153_s28  ;;  %s483_s11 = scalar_lea.hbm %s690_s6, 128 }
  0x17   : > { %p484_p3 = scmp.ne.s32.totalorder %s690_s6, %s483_s11  ;;  %p485_p5 = pneg %p696_p0 }
  0x18   : > { %s488_s21 = scalar_lea.hbm %s803_s0, 256  ;;  %p489_p4 = scmp.lt.u32.totalorder %s690_s6, %s803_s0 }
  0x19   : > { %p486_p6 = pnand %p485_p5, %p484_p3  ;;  %p490_p10 = scmp.lt.u32.totalorder %s488_s21, %s483_s11 }
  0x1a   : > { %p492_p12 = scmp.lt.u32.totalorder %s483_s11, %s690_s6 }
  0x1b   : > { %p487_p7 = pneg %p486_p6  ;;  %p491_p13 = por %p490_p10, %p489_p4 }
  0x1d   : > { %p493_p1 = por %p492_p12, %p491_p13 }
  0x1f   : > { %p494_p2 = pnand %p493_p1, %p487_p7 }
  0x21   : > { %497 = shalt.err (!%p494_p2)
}
  0x22   : > { %s498_s28 = scalar_lea.vmem %s692_s8, 128  ;;  %s597_s29 = smov [#allocation2]  }
  0x23   : > { %p499_p3 = scmp.ne.s32.totalorder %s692_s8, %s498_s28  ;;  %s503_s30 = sshll.u32 %s597_s29, 4  ;;  %s504_s30 = int_to_ptr.vmem [resolvable:$false] %s503_s30 }
  0x24   : > { %s505_s4 = scalar_lea.vmem %s504_s30, 256  ;;  %p506_p9 = scmp.lt.s32.totalorder %s692_s8, %s504_s30 }
  0x25   : > { %p501_p6 = pnand %p499_p3, %p485_p5  ;;  %p507_p4 = scmp.lt.s32.totalorder %s505_s4, %s498_s28 }
  0x27   : > { %p502_p11 = pneg %p501_p6  ;;  %p508_p10 = por %p507_p4, %p506_p9 }
  0x29   : > { %p509_p12 = pnand %p508_p10, %p502_p11 }
  0x2b   : > { %512 = shalt.err (!%p509_p12)
}
  0x2c   : > { %420 = dma.hbm_to_vmem [thread:$0]  (!%p696_p0), %s690_s6, 128, %s692_s8, %s154_s10  }
  0x2d   : > { %p813_p1 = scmp.lt.s32.totalorder %s595_s17, 3  ;;  %p814_p2 = scmp.ge.s32.totalorder %s595_s17, 1 }
  0x2f   : > { %p173_p5 = pnand %p814_p2, %p813_p1 }
  0x30   : > { %s732_s5 = sand.u32 (!%p173_p5), 1, %s579_s13  }
  0x31   : > { %176 = sbr.rel (%p173_p5) target bundleno = 209 (0xd1), region = 32  ;;  %s404_s7 = sshll.u32 (!%p173_p5), %s732_s5, 3 }
  0x32   : > { %s179_s11 = scalar_lea.sflag (!%p173_p5), [#allocation3], %s732_s5  ;;  %s182_s9 = scalar_lea.vmem (!%p173_p5), [#allocation2], %s404_s7 }
  0x38   : > { %566 = dma.done.wait (%p668_p8), %s179_s11, 128  }
  0x39   : > { %568 = vsyncadd (%p668_p8), %s179_s11, 4294967168  ;;  %v598_v0 = vmov 0   ;;  %v266_v1 = vld [vmem:[%s804_s1] sm:$0xf]  ;;  %vm211_vm0 = vcmask 1043456   ;;  %v274_v47 = vlaneseq  ;;  %s412_s24 = sshll.u32 %s587_s15, 7 }
  0x3a   : > { %477 = vset.pattern.permute.xlu0 %v598_v0  ;;  %v280_v2 = vld [vmem:[%s805_s2] sm:$0xf]  ;;  %v599_v45 = vmov 839922192   ;;  %s204_s19 = scalar_lea.vmem [#allocation5], %s404_s7  ;;  %s754_s28 = scalar_lea.hbm %s806_s3, %s412_s24 }
  0x3b   : > { %269 = vperm.xlu0 %477, %v266_v1   ;;  %v207_v3 = vld [vmem:[%s182_s9] sm:$0xff]  ;;  %v272_v46 = vunpack.c.l.s4 %v599_v45  ;;  %v275_v50 = vshrl.u32 %v274_v47, 7  ;;  %s312_s21 = sshll.u32 %s204_s19, 4  ;;  %s296_s29 = scalar_lea.sflag [#allocation4], %s732_s5  ;;  %s756_s21 = int_to_ptr.vmem [resolvable:$true] %s312_s21 }
  0x3c   : > { %v209_v4 = vcombine.high %v207_v3, %v207_v3  ;;  %v228_v5 = vmul.f32 %v207_v3, %v207_v3  ;;  %v212_v6 = vsel %vm211_vm0, %v207_v3, 0.0  ;;  %s513_s30 = scalar_lea.vmem %s756_s21, 128  ;;  %p815_p9 = scmp.ne.s32.totalorder %s810_s25, 0 }
  0x3d   : > { %v213_v9 = vrot.slane %v212_v6, 4  ;;  %v273_v49 = vunpack.c.0.s8 %v272_v46  ;;  %p514_p8 = scmp.ne.s32.totalorder %s756_s21, %s513_s30  ;;  %s600_s15 = smov [#allocation5]  }
  0x3e   : > { %v219_v7 = vsel %vm211_vm0, %v209_v4, 0.0  ;;  %v230_v8 = vcombine.high %v228_v5, %v228_v5  ;;  %v232_v11 = vsel %vm211_vm0, %v228_v5, 0.0  ;;  %s517_s4 = sshll.u32 %s600_s15, 4  ;;  %s518_s4 = int_to_ptr.vmem [resolvable:$false] %s517_s4 }
  0x3f   : > { %283 = vperm.xlu0 %477, %v280_v2   ;;  %v220_v10 = vrot.slane %v219_v7, 4  ;;  %v214_v13 = vadd.f32 %v213_v9, %v212_v6  ;;  %v233_v14 = vrot.slane %v232_v11, 4  ;;  %v276_v53 = vsub.s32 %v273_v49, %v275_v50  ;;  %p515_p11 = pnand %p514_p8, %p815_p9  ;;  %s519_s7 = scalar_lea.vmem %s518_s4, 256 }
  0x40   : > { %v239_v12 = vsel %vm211_vm0, %v230_v8, 0.0  ;;  %p520_p7 = scmp.lt.s32.totalorder %s756_s21, %s518_s4  ;;  %p521_p13 = scmp.lt.s32.totalorder %s519_s7, %s513_s30 }
  0x41   : > { %v221_v15 = vadd.f32 %v220_v10, %v219_v7  ;;  %v240_v16 = vrot.slane %v239_v12, 4  ;;  %v215_v17 = vrot.slane %v214_v13, 2  ;;  %v234_v18 = vadd.f32 %v233_v14, %v232_v11  ;;  %p516_p0 = pneg %p515_p11 }
  0x42   : > { %p522_p3 = por %p521_p13, %p520_p7 }
  0x43   : > { %v222_v19 = vrot.slane %v221_v15, 2  ;;  %v241_v20 = vadd.f32 %v240_v16, %v239_v12  ;;  %v216_v21 = vadd.f32 %v215_v17, %v214_v13  ;;  %v235_v22 = vrot.slane %v234_v18, 2 }
  0x44   : > { %p523_p6 = pnand %p522_p3, %p516_p0 }
  0x45   : > { %v223_v23 = vadd.f32 %v222_v19, %v221_v15  ;;  %v242_v24 = vrot.slane %v241_v20, 2  ;;  %v217_v25 = vrot.slane %v216_v21, 1  ;;  %v236_v26 = vadd.f32 %v235_v22, %v234_v18 }
  0x47   : > { %v224_v27 = vrot.slane %v223_v23, 1  ;;  %v243_v28 = vadd.f32 %v242_v24, %v241_v20  ;;  %v218_v29 = vadd.f32 %v217_v25, %v216_v21  ;;  %v237_v30 = vrot.slane %v236_v26, 1 }
  0x49   : > { %v225_v31 = vadd.f32 %v224_v27, %v223_v23  ;;  %v244_v32 = vrot.slane %v243_v28, 1  ;;  %v226_v33 = vmul.f32 0.25, %v218_v29  ;;  %v238_v34 = vadd.f32 %v237_v30, %v236_v26 }
  0x4b   : > { %v227_v35 = vmul.f32 0.25, %v225_v31  ;;  %v245_v36 = vadd.f32 %v244_v32, %v243_v28  ;;  %v246_v37 = vmul.f32 0.25, %v238_v34  ;;  %v248_v38 = vmul.f32 %v226_v33, %v226_v33 }
  0x4d   : > { %v247_v39 = vmul.f32 0.25, %v245_v36  ;;  %v249_v40 = vmul.f32 %v227_v35, %v227_v35  ;;  %v250_v41 = vsub.f32 %v246_v37, %v248_v38  ;;  %v258_v51 = vcombine.low %v226_v33, %v227_v35 }
  0x4f   : > { %v251_v42 = vsub.f32 %v247_v39, %v249_v40  ;;  %v252_v43 = vadd.f32 1e-05, %v250_v41  ;;  %v260_v54 = vsub.f32 %v207_v3, %v258_v51 }
  0x51   : > { %v253_v44 = vadd.f32 1e-05, %v251_v42  ;;  %479 = vrsqrt.f32 %v252_v43 }
  0x53   : > { %481 = vrsqrt.f32 %v253_v44 }
  0x5b   : > { %v480_v48 = vpop.eup %479 }
  0x5d   : > { %v482_v52 = vpop.eup %481 }
  0x5e   : > { %v263_v55 = vcombine.low %v480_v48, %v482_v52 }
  0x60   : > { %v265_v57 = vmul.f32 %v263_v55, %v260_v54 }
  0xba   : > { %v270_v56 = vpop.permute.xlu0 %269 }
  0xbb   : > { %v277_v58 = vrot.slane %v270_v56, %v276_v53 }
  0xbd   : > { %v279_v60 = vmul.f32 %v277_v58, %v265_v57 }
  0xbe   : > { %v284_v59 = vpop.permute.xlu0 %283 }
  0xbf   : > { %v291_v61 = vrot.slane %v284_v59, %v276_v53 }
  0xc1   : > { %v293_v62 = vadd.f32 %v291_v61, %v279_v60 }
  0xc3   : > { %294 = vst [vmem:[%s204_s19] sm:$0xff] %v293_v62 }
  0xc4   : > { %526 = shalt.err (!%p523_p6)
}
  0xc5   : > { %s527_s5 = scalar_lea.hbm %s754_s28, 128  ;;  %s531_s6 = scalar_lea.hbm %s806_s3, 256 }
  0xc6   : > { %p528_p4 = scmp.ne.s32.totalorder %s754_s28, %s527_s5  ;;  %p532_p1 = scmp.lt.u32.totalorder %s754_s28, %s806_s3 }
  0xc7   : > { %p533_p2 = scmp.lt.u32.totalorder %s531_s6, %s527_s5  ;;  %p535_p8 = scmp.lt.u32.totalorder %s527_s5, %s754_s28 }
  0xc8   : > { %p529_p10 = pnand %p528_p4, %p815_p9 }
  0xc9   : > { %p534_p5 = por %p533_p2, %p532_p1 }
  0xca   : > { %p530_p12 = pneg %p529_p10 }
  0xcb   : > { %p536_p11 = por %p535_p8, %p534_p5 }
  0xcd   : > { %p537_p0 = pnand %p536_p11, %p530_p12 }
  0xcf   : > { %540 = shalt.err (!%p537_p0)
}
  0xd0   : > { %415 = dma.vmem_to_hbm [thread:$0]  (%p815_p9), %s756_s21, 128, %s754_s28, %s296_s29  }
  0xd1 PF: > { %s324_s18 = sand.u32 1, %s575_s12   ;;  %p816_p7 = scmp.ne.s32.totalorder %s811_s27, 0 }
  0xd2   : > { %p817_p13 = scmp.ge.s32.totalorder %s595_s17, 2  ;;  %s325_s24 = scalar_lea.sflag [#allocation4], %s324_s18 }
  0xd4   : > { %p422_p3 = pnand %p817_p13, %p816_p7 }
  0xd6   : > { %570 = dma.done.wait (!%p422_p3), %s325_s24, 128  }
  0xd7   : > { %572 = vsyncadd (!%p422_p3), %s325_s24, 4294967168  ;;  %s19_s17 = sadd.s32 1, %s595_s17   ;;  %s818_s12 = smov %s579_s13 }
  0xd8   : > { %p16_p6 = scmp.ge.s32.totalorder %s19_s17, 4   ;;  %s819_s13 = smov %s583_s14 }
  0xd9   : > { %s820_s14 = smov %s677_s26  ;;  %s821_s15 = smov %s591_s16 }
  0xda   : > { %s822_s16 = smov %s824_s20  ;;  %18 = sbr.rel (!%p16_p6) target bundleno = 6 (0x6), region = 77 }
  0xe1   :  { %330 = vsyncpa [#allocation3], 1 }
  0xe2   :  { %332 = vsyncpa [#allocation3 + $0x1], 1 }
  0xe3   :  { %333 = vsyncpa [#allocation4], 1 }
  0xe4   :  { %335 = vsyncpa [#allocation4 + $0x1], 1 }

</bundles_post_ra>
